<compile_context>
chip_gen: v6e
topology: v6e:2x2x1
jax: 0.10.0
libtpu: 0.0.40
codegen_flags: <defaults>
</compile_context>

<pallas_src>
import jax
import jax.numpy as jnp
from jax.experimental import pallas as pl
from jax.experimental.pallas import tpu as pltpu

PAD = 128                       # lane-dense padded feature width for every layer
NUM_LAYERS = 6
LAYER_DIMS = [(2, 20), (20, 20), (20, 20), (20, 20), (20, 20), (20, 2)]
BIAS_ROW = PAD - 1              # padded input lane reserved for the constant-1 bias trick
SUBCHUNKS = 2                   # independent in-kernel batch sub-chunks (breaks dep chain)
ROW_ALIGN = 8 * SUBCHUNKS       # batch tile must split into sublane-aligned sub-chunks
TB_CAP = 2048                   # ~1 MiB f32 output block; far under VMEM on v5e/v6e/v7x


def mlp_kernel(x_ref, w_ref, o_ref):
    # x_ref: [TB, 2]        raw f32 input rows (no lane padding -> tiny HBM traffic)
    # w_ref: [6, 128, 128]  bf16, zero-padded [in, out]; bias folded into row BIAS_ROW,
    #                       w_ref[l, BIAS_ROW, BIAS_ROW] == 1 re-propagates the constant lane
    # o_ref: [TB, 128]      lane-dense f32 output block (only lanes 0..1 meaningful)
    tb = x_ref.shape[0]
    cs = tb // SUBCHUNKS

    # Layer-0 rows, hoisted: shared by both sub-chunks, cast once to f32 for the VPU path.
    w0 = w_ref[0].astype(jnp.float32)              # [128, 128], tiny
    w0_r0 = w0[0:1, :]                             # weight row for input feature 0
    w0_r1 = w0[1:2, :]                             # weight row for input feature 1
    w0_b = w0[BIAS_ROW:BIAS_ROW + 1, :]            # bias row (+1.0 in the constant lane)

    # Two independent sub-chunks -> the LLO scheduler interleaves their matmuls,
    # hiding each layer's MXU drain / ReLU / bf16-cast epilogue under the other chunk.
    for c in range(SUBCHUNKS):
        lo, hi = c * cs, (c + 1) * cs
        x = x_ref[lo:hi, :]                        # [cs, 2] static slice

        # Layer 0 (2 -> 20) off the MXU: two broadcast multiply-adds on the VPU.
        h = jnp.maximum(x[:, 0:1] * w0_r0 + x[:, 1:2] * w0_r1 + w0_b, 0.0)

        # Layers 1..4: bf16 MXU matmuls, f32 accumulation.  Bias rides the
        # constant lane, so there is no separate bias broadcast/add.
        for l in range(1, NUM_LAYERS - 1):
            h = jnp.maximum(
                jnp.dot(h.astype(jnp.bfloat16), w_ref[l],
                        preferred_element_type=jnp.float32),
                0.0)

        # Layer 5 (20 -> 2), no ReLU.  Lane-dense [cs, 128] store (unmasked vst).
        o_ref[lo:hi, :] = jnp.dot(h.astype(jnp.bfloat16), w_ref[NUM_LAYERS - 1],
                                  preferred_element_type=jnp.float32)


def _round_up(n, m):
    return ((n + m - 1) // m) * m


def _cdiv(a, b):
    return -(-a // b)


def pack_params(params):
    """Pack per-layer (W [in,out], b [out]) into one bf16 buffer with folded biases.

    Layout per layer l (zero elsewhere):
      w_packed[l, :fi, :fo]            = W_l
      w_packed[l, BIAS_ROW, :fo]       = b_l          (bias applied via constant lane)
      w_packed[l, BIAS_ROW, BIAS_ROW]  = 1.0          (keeps the constant lane == 1)
    """
    w_packed = jnp.zeros((NUM_LAYERS, PAD, PAD), jnp.float32)
    for l, (w, b) in enumerate(params):
        fi, fo = w.shape
        w_packed = w_packed.at[l, :fi, :fo].set(w)
        w_packed = w_packed.at[l, BIAS_ROW, :fo].set(b.reshape(-1))
        w_packed = w_packed.at[l, BIAS_ROW, BIAS_ROW].set(1.0)
    return w_packed.astype(jnp.bfloat16)


def simplenet2_forward(x, w_packed):
    """x: [B, 2] float32. Returns [B, 2] float32."""
    B, F = x.shape
    out_dim = LAYER_DIMS[-1][1]

    # Batch tile: at least 2 grid steps (so ("parallel",) shards across both v7x
    # TensorCores), capped at TB_CAP, and sized from ceil(B / n_tiles) so B_pad
    # never balloons when B is just above a tile multiple.
    n_tiles = max(2, _cdiv(B, TB_CAP))
    TB = max(ROW_ALIGN, _round_up(_cdiv(B, n_tiles), ROW_ALIGN))
    B_pad = max(_round_up(B, TB), 2 * TB)

    # Only row padding (8 B/row) -- no lane padding of the input in the wrapper.
    if B_pad == B:
        x_pad = x.astype(jnp.float32)
    else:
        x_pad = jnp.zeros((B_pad, F), jnp.float32).at[:B].set(x.astype(jnp.float32))

    # VMEM footprint: 2*(TB*128*4) out + 2*(TB*2*4) in + 2*(6*128*128*2) weights
    # + intermediates  ->  a few MiB at TB=2048, well under every generation's
    # scoped-VMEM default, so vmem_limit_bytes is left untouched.
    out = pl.pallas_call(
        mlp_kernel,
        out_shape=jax.ShapeDtypeStruct((B_pad, PAD), jnp.float32),
        grid=(B_pad // TB,),
        in_specs=[
            pl.BlockSpec((TB, F), lambda i: (i, 0)),
            # Constant index_map -> packed weights stay resident in VMEM.
            pl.BlockSpec((NUM_LAYERS, PAD, PAD), lambda i: (0, 0, 0)),
        ],
        out_specs=pl.BlockSpec((TB, PAD), lambda i: (i, 0)),
        compiler_params=pltpu.CompilerParams(
            dimension_semantics=("parallel",)),
    )(x_pad, w_packed)

    return out[:B, :out_dim]


def init_params(key):
    """Deterministic init matching PyTorch Linear (weight stored transposed [in,out])."""
    params = []
    for (fan_in, fan_out) in LAYER_DIMS:
        key, kw, kb = jax.random.split(key, 3)
        bound = fan_in ** -0.5
        w = jax.random.uniform(kw, (fan_in, fan_out), jnp.float32, -bound, bound)
        b = jax.random.uniform(kb, (fan_out,), jnp.float32, -bound, bound)
        params.append((w, b))
    return params


def reference_forward_f32(x, params):
    """Pure f32 reference (matches the PyTorch module's semantics)."""
    h = x
    for i, (w, b) in enumerate(params):
        h = h @ w + b[None, :]
        if i < len(params) - 1:
            h = jnp.maximum(h, 0.0)
    return h


def reference_forward_bf16(x, params):
    """Reference mirroring the kernel's numerics: bf16 weights/activation inputs,
    f32 accumulation, layer 0 computed as f32 broadcast multiply-adds."""
    h = x
    for i, (w, b) in enumerate(params):
        wl = w.astype(jnp.bfloat16).astype(jnp.float32)
        bl = b.astype(jnp.bfloat16).astype(jnp.float32)
        if i == 0:
            h = h[:, 0:1] * wl[0:1, :] + h[:, 1:2] * wl[1:2, :] + bl[None, :]
        else:
            h = jnp.dot(h.astype(jnp.bfloat16), w.astype(jnp.bfloat16),
                        preferred_element_type=jnp.float32) + bl[None, :]
        if i < len(params) - 1:
            h = jnp.maximum(h, 0.0)
    return h


if __name__ == "__main__":
    key = jax.random.PRNGKey(0)
    key, kx = jax.random.split(key)

    B = 8
    x = jax.random.normal(kx, (B, 2), jnp.float32)
    params = init_params(key)
    w_packed = pack_params(params)

    out = simplenet2_forward(x, w_packed)
    out = jax.block_until_ready(out)
    assert out.shape == (B, 2), out.shape

    # Tight check against a reference that emulates the kernel's bf16-input /
    # f32-accumulate numerics.
    ref_bf16 = reference_forward_bf16(x, params)
    assert jnp.allclose(out, ref_bf16, atol=2e-3, rtol=2e-3), (out, ref_bf16)

    # Loose check against the exact f32 module semantics (bf16 weight rounding
    # makes 1e-5 infeasible; see perf-review correctness note).
    ref_f32 = reference_forward_f32(x, params)
    assert jnp.allclose(out, ref_f32, atol=5e-2, rtol=5e-2), (out, ref_f32)

    print("KERNEL_OK")
</pallas_src>

<mosaic_0001>
module attributes {stable_mosaic.version = 11 : i64} {
  func.func @mlp_kernel(%arg0: i32, %arg1: memref<16x2xf32, #tpu.memory_space<vmem>>, %arg2: memref<6x128x128xbf16, #tpu.memory_space<vmem>>, %arg3: memref<16x128xf32, #tpu.memory_space<vmem>>) attributes {dimension_semantics = [#tpu.dimension_semantics<parallel>], iteration_bounds = array<i64: 2>, scalar_prefetch = 0 : i64, scratch_operands = 0 : i64, tpu.core_type = #tpu.core_type<tc>, window_params = [{transform_indices = @transform_0, window_bounds = array<i64: 16, 2>}, {pipeline_mode = #tpu.pipeline_mode<synchronous>, transform_indices = @transform_1, window_bounds = array<i64: 6, 128, 128>}, {transform_indices = @transform_2, window_bounds = array<i64: 16, 128>}]} {
    %c0 = arith.constant 0 : index
    %c0_0 = arith.constant 0 : index
    %c0_1 = arith.constant 0 : index
    %0 = vector.load %arg2[%c0, %c0_0, %c0_1] : memref<6x128x128xbf16, #tpu.memory_space<vmem>>, vector<1x128x128xbf16>
    %1 = vector.shape_cast %0 : vector<1x128x128xbf16> to vector<128x128xbf16>
    %2 = arith.extf %1 : vector<128x128xbf16> to vector<128x128xf32>
    %3 = vector.extract_strided_slice %2 {offsets = [0, 0], sizes = [1, 128], strides = [1, 1]} : vector<128x128xf32> to vector<1x128xf32>
    %4 = vector.extract_strided_slice %2 {offsets = [1, 0], sizes = [1, 128], strides = [1, 1]} : vector<128x128xf32> to vector<1x128xf32>
    %5 = vector.extract_strided_slice %2 {offsets = [127, 0], sizes = [1, 128], strides = [1, 1]} : vector<128x128xf32> to vector<1x128xf32>
    %c0_2 = arith.constant 0 : index
    %c0_3 = arith.constant 0 : index
    %6 = vector.load %arg1[%c0_2, %c0_3] : memref<16x2xf32, #tpu.memory_space<vmem>>, vector<8x2xf32>
    %7 = vector.extract_strided_slice %6 {offsets = [0, 0], sizes = [8, 1], strides = [1, 1]} : vector<8x2xf32> to vector<8x1xf32>
    %8 = vector.broadcast %7 : vector<8x1xf32> to vector<8x128xf32>
    %9 = vector.broadcast %3 : vector<1x128xf32> to vector<8x128xf32>
    %10 = arith.mulf %8, %9 : vector<8x128xf32>
    %11 = vector.extract_strided_slice %6 {offsets = [0, 1], sizes = [8, 1], strides = [1, 1]} : vector<8x2xf32> to vector<8x1xf32>
    %12 = vector.broadcast %11 : vector<8x1xf32> to vector<8x128xf32>
    %13 = vector.broadcast %4 : vector<1x128xf32> to vector<8x128xf32>
    %14 = arith.mulf %12, %13 : vector<8x128xf32>
    %15 = arith.addf %10, %14 : vector<8x128xf32>
    %16 = vector.broadcast %5 : vector<1x128xf32> to vector<8x128xf32>
    %17 = arith.addf %15, %16 : vector<8x128xf32>
    %cst = arith.constant 0.000000e+00 : f32
    %18 = vector.broadcast %cst : f32 to vector<8x128xf32>
    %19 = arith.maximumf %17, %18 : vector<8x128xf32>
    %20 = arith.truncf %19 : vector<8x128xf32> to vector<8x128xbf16>
    %c1 = arith.constant 1 : index
    %c0_4 = arith.constant 0 : index
    %c0_5 = arith.constant 0 : index
    %21 = vector.load %arg2[%c1, %c0_4, %c0_5] : memref<6x128x128xbf16, #tpu.memory_space<vmem>>, vector<1x128x128xbf16>
    %22 = vector.shape_cast %21 : vector<1x128x128xbf16> to vector<128x128xbf16>
    %cst_6 = arith.constant dense<0.000000e+00> : vector<8x128xf32>
    %23 = tpu.matmul %20, %22, %cst_6 {dimension_numbers = #tpu.dot_dimension_numbers<[1], [0], [0], [1], [0, 0, 1, 1], [], []>} : vector<8x128xbf16>, vector<128x128xbf16>, vector<8x128xf32> -> vector<8x128xf32>
    %cst_7 = arith.constant 0.000000e+00 : f32
    %24 = vector.broadcast %cst_7 : f32 to vector<8x128xf32>
    %25 = arith.maximumf %23, %24 : vector<8x128xf32>
    %26 = arith.truncf %25 : vector<8x128xf32> to vector<8x128xbf16>
    %c2 = arith.constant 2 : index
    %c0_8 = arith.constant 0 : index
    %c0_9 = arith.constant 0 : index
    %27 = vector.load %arg2[%c2, %c0_8, %c0_9] : memref<6x128x128xbf16, #tpu.memory_space<vmem>>, vector<1x128x128xbf16>
    %28 = vector.shape_cast %27 : vector<1x128x128xbf16> to vector<128x128xbf16>
    %cst_10 = arith.constant dense<0.000000e+00> : vector<8x128xf32>
    %29 = tpu.matmul %26, %28, %cst_10 {dimension_numbers = #tpu.dot_dimension_numbers<[1], [0], [0], [1], [0, 0, 1, 1], [], []>} : vector<8x128xbf16>, vector<128x128xbf16>, vector<8x128xf32> -> vector<8x128xf32>
    %cst_11 = arith.constant 0.000000e+00 : f32
    %30 = vector.broadcast %cst_11 : f32 to vector<8x128xf32>
    %31 = arith.maximumf %29, %30 : vector<8x128xf32>
    %32 = arith.truncf %31 : vector<8x128xf32> to vector<8x128xbf16>
    %c3 = arith.constant 3 : index
    %c0_12 = arith.constant 0 : index
    %c0_13 = arith.constant 0 : index
    %33 = vector.load %arg2[%c3, %c0_12, %c0_13] : memref<6x128x128xbf16, #tpu.memory_space<vmem>>, vector<1x128x128xbf16>
    %34 = vector.shape_cast %33 : vector<1x128x128xbf16> to vector<128x128xbf16>
    %cst_14 = arith.constant dense<0.000000e+00> : vector<8x128xf32>
    %35 = tpu.matmul %32, %34, %cst_14 {dimension_numbers = #tpu.dot_dimension_numbers<[1], [0], [0], [1], [0, 0, 1, 1], [], []>} : vector<8x128xbf16>, vector<128x128xbf16>, vector<8x128xf32> -> vector<8x128xf32>
    %cst_15 = arith.constant 0.000000e+00 : f32
    %36 = vector.broadcast %cst_15 : f32 to vector<8x128xf32>
    %37 = arith.maximumf %35, %36 : vector<8x128xf32>
    %38 = arith.truncf %37 : vector<8x128xf32> to vector<8x128xbf16>
    %c4 = arith.constant 4 : index
    %c0_16 = arith.constant 0 : index
    %c0_17 = arith.constant 0 : index
    %39 = vector.load %arg2[%c4, %c0_16, %c0_17] : memref<6x128x128xbf16, #tpu.memory_space<vmem>>, vector<1x128x128xbf16>
    %40 = vector.shape_cast %39 : vector<1x128x128xbf16> to vector<128x128xbf16>
    %cst_18 = arith.constant dense<0.000000e+00> : vector<8x128xf32>
    %41 = tpu.matmul %38, %40, %cst_18 {dimension_numbers = #tpu.dot_dimension_numbers<[1], [0], [0], [1], [0, 0, 1, 1], [], []>} : vector<8x128xbf16>, vector<128x128xbf16>, vector<8x128xf32> -> vector<8x128xf32>
    %cst_19 = arith.constant 0.000000e+00 : f32
    %42 = vector.broadcast %cst_19 : f32 to vector<8x128xf32>
    %43 = arith.maximumf %41, %42 : vector<8x128xf32>
    %44 = arith.truncf %43 : vector<8x128xf32> to vector<8x128xbf16>
    %c5 = arith.constant 5 : index
    %c0_20 = arith.constant 0 : index
    %c0_21 = arith.constant 0 : index
    %45 = vector.load %arg2[%c5, %c0_20, %c0_21] : memref<6x128x128xbf16, #tpu.memory_space<vmem>>, vector<1x128x128xbf16>
    %46 = vector.shape_cast %45 : vector<1x128x128xbf16> to vector<128x128xbf16>
    %cst_22 = arith.constant dense<0.000000e+00> : vector<8x128xf32>
    %47 = tpu.matmul %44, %46, %cst_22 {dimension_numbers = #tpu.dot_dimension_numbers<[1], [0], [0], [1], [0, 0, 1, 1], [], []>} : vector<8x128xbf16>, vector<128x128xbf16>, vector<8x128xf32> -> vector<8x128xf32>
    %c0_23 = arith.constant 0 : index
    %c0_24 = arith.constant 0 : index
    %48 = vector.load %arg3[%c0_23, %c0_24] : memref<16x128xf32, #tpu.memory_space<vmem>>, vector<8x128xf32>
    tpu.vector_store %arg3[%c0_23, %c0_24], %47 {strides = array<i32>} : memref<16x128xf32, #tpu.memory_space<vmem>>, vector<8x128xf32>,
    %c8 = arith.constant 8 : index
    %c0_25 = arith.constant 0 : index
    %49 = vector.load %arg1[%c8, %c0_25] : memref<16x2xf32, #tpu.memory_space<vmem>>, vector<8x2xf32>
    %50 = vector.extract_strided_slice %49 {offsets = [0, 0], sizes = [8, 1], strides = [1, 1]} : vector<8x2xf32> to vector<8x1xf32>
    %51 = vector.broadcast %50 : vector<8x1xf32> to vector<8x128xf32>
    %52 = vector.broadcast %3 : vector<1x128xf32> to vector<8x128xf32>
    %53 = arith.mulf %51, %52 : vector<8x128xf32>
    %54 = vector.extract_strided_slice %49 {offsets = [0, 1], sizes = [8, 1], strides = [1, 1]} : vector<8x2xf32> to vector<8x1xf32>
    %55 = vector.broadcast %54 : vector<8x1xf32> to vector<8x128xf32>
    %56 = vector.broadcast %4 : vector<1x128xf32> to vector<8x128xf32>
    %57 = arith.mulf %55, %56 : vector<8x128xf32>
    %58 = arith.addf %53, %57 : vector<8x128xf32>
    %59 = vector.broadcast %5 : vector<1x128xf32> to vector<8x128xf32>
    %60 = arith.addf %58, %59 : vector<8x128xf32>
    %cst_26 = arith.constant 0.000000e+00 : f32
    %61 = vector.broadcast %cst_26 : f32 to vector<8x128xf32>
    %62 = arith.maximumf %60, %61 : vector<8x128xf32>
    %63 = arith.truncf %62 : vector<8x128xf32> to vector<8x128xbf16>
    %c1_27 = arith.constant 1 : index
    %c0_28 = arith.constant 0 : index
    %c0_29 = arith.constant 0 : index
    %64 = vector.load %arg2[%c1_27, %c0_28, %c0_29] : memref<6x128x128xbf16, #tpu.memory_space<vmem>>, vector<1x128x128xbf16>
    %65 = vector.shape_cast %64 : vector<1x128x128xbf16> to vector<128x128xbf16>
    %cst_30 = arith.constant dense<0.000000e+00> : vector<8x128xf32>
    %66 = tpu.matmul %63, %65, %cst_30 {dimension_numbers = #tpu.dot_dimension_numbers<[1], [0], [0], [1], [0, 0, 1, 1], [], []>} : vector<8x128xbf16>, vector<128x128xbf16>, vector<8x128xf32> -> vector<8x128xf32>
    %cst_31 = arith.constant 0.000000e+00 : f32
    %67 = vector.broadcast %cst_31 : f32 to vector<8x128xf32>
    %68 = arith.maximumf %66, %67 : vector<8x128xf32>
    %69 = arith.truncf %68 : vector<8x128xf32> to vector<8x128xbf16>
    %c2_32 = arith.constant 2 : index
    %c0_33 = arith.constant 0 : index
    %c0_34 = arith.constant 0 : index
    %70 = vector.load %arg2[%c2_32, %c0_33, %c0_34] : memref<6x128x128xbf16, #tpu.memory_space<vmem>>, vector<1x128x128xbf16>
    %71 = vector.shape_cast %70 : vector<1x128x128xbf16> to vector<128x128xbf16>
    %cst_35 = arith.constant dense<0.000000e+00> : vector<8x128xf32>
    %72 = tpu.matmul %69, %71, %cst_35 {dimension_numbers = #tpu.dot_dimension_numbers<[1], [0], [0], [1], [0, 0, 1, 1], [], []>} : vector<8x128xbf16>, vector<128x128xbf16>, vector<8x128xf32> -> vector<8x128xf32>
    %cst_36 = arith.constant 0.000000e+00 : f32
    %73 = vector.broadcast %cst_36 : f32 to vector<8x128xf32>
    %74 = arith.maximumf %72, %73 : vector<8x128xf32>
    %75 = arith.truncf %74 : vector<8x128xf32> to vector<8x128xbf16>
    %c3_37 = arith.constant 3 : index
    %c0_38 = arith.constant 0 : index
    %c0_39 = arith.constant 0 : index
    %76 = vector.load %arg2[%c3_37, %c0_38, %c0_39] : memref<6x128x128xbf16, #tpu.memory_space<vmem>>, vector<1x128x128xbf16>
    %77 = vector.shape_cast %76 : vector<1x128x128xbf16> to vector<128x128xbf16>
    %cst_40 = arith.constant dense<0.000000e+00> : vector<8x128xf32>
    %78 = tpu.matmul %75, %77, %cst_40 {dimension_numbers = #tpu.dot_dimension_numbers<[1], [0], [0], [1], [0, 0, 1, 1], [], []>} : vector<8x128xbf16>, vector<128x128xbf16>, vector<8x128xf32> -> vector<8x128xf32>
    %cst_41 = arith.constant 0.000000e+00 : f32
    %79 = vector.broadcast %cst_41 : f32 to vector<8x128xf32>
    %80 = arith.maximumf %78, %79 : vector<8x128xf32>
    %81 = arith.truncf %80 : vector<8x128xf32> to vector<8x128xbf16>
    %c4_42 = arith.constant 4 : index
    %c0_43 = arith.constant 0 : index
    %c0_44 = arith.constant 0 : index
    %82 = vector.load %arg2[%c4_42, %c0_43, %c0_44] : memref<6x128x128xbf16, #tpu.memory_space<vmem>>, vector<1x128x128xbf16>
    %83 = vector.shape_cast %82 : vector<1x128x128xbf16> to vector<128x128xbf16>
    %cst_45 = arith.constant dense<0.000000e+00> : vector<8x128xf32>
    %84 = tpu.matmul %81, %83, %cst_45 {dimension_numbers = #tpu.dot_dimension_numbers<[1], [0], [0], [1], [0, 0, 1, 1], [], []>} : vector<8x128xbf16>, vector<128x128xbf16>, vector<8x128xf32> -> vector<8x128xf32>
    %cst_46 = arith.constant 0.000000e+00 : f32
    %85 = vector.broadcast %cst_46 : f32 to vector<8x128xf32>
    %86 = arith.maximumf %84, %85 : vector<8x128xf32>
    %87 = arith.truncf %86 : vector<8x128xf32> to vector<8x128xbf16>
    %c5_47 = arith.constant 5 : index
    %c0_48 = arith.constant 0 : index
    %c0_49 = arith.constant 0 : index
    %88 = vector.load %arg2[%c5_47, %c0_48, %c0_49] : memref<6x128x128xbf16, #tpu.memory_space<vmem>>, vector<1x128x128xbf16>
    %89 = vector.shape_cast %88 : vector<1x128x128xbf16> to vector<128x128xbf16>
    %cst_50 = arith.constant dense<0.000000e+00> : vector<8x128xf32>
    %90 = tpu.matmul %87, %89, %cst_50 {dimension_numbers = #tpu.dot_dimension_numbers<[1], [0], [0], [1], [0, 0, 1, 1], [], []>} : vector<8x128xbf16>, vector<128x128xbf16>, vector<8x128xf32> -> vector<8x128xf32>
    %c8_51 = arith.constant 8 : index
    %c0_52 = arith.constant 0 : index
    %91 = vector.load %arg3[%c8_51, %c0_52] : memref<16x128xf32, #tpu.memory_space<vmem>>, vector<8x128xf32>
    tpu.vector_store %arg3[%c8_51, %c0_52], %90 {strides = array<i32>} : memref<16x128xf32, #tpu.memory_space<vmem>>, vector<8x128xf32>,
    return
  }
  func.func @transform_0(%arg0: i32) -> (i32, i32) {
    %c0_i32 = arith.constant 0 : i32
    %c0_i32_0 = arith.constant 0 : i32
    return %arg0, %c0_i32 : i32, i32
  }
  func.func @transform_1(%arg0: i32) -> (i32, i32, i32) {
    %c0_i32 = arith.constant 0 : i32
    %c0_i32_0 = arith.constant 0 : i32
    %c0_i32_1 = arith.constant 0 : i32
    %c0_i32_2 = arith.constant 0 : i32
    return %c0_i32, %c0_i32_0, %c0_i32_1 : i32, i32, i32
  }
  func.func @transform_2(%arg0: i32) -> (i32, i32) {
    %c0_i32 = arith.constant 0 : i32
    %c0_i32_0 = arith.constant 0 : i32
    return %arg0, %c0_i32 : i32, i32
  }
}

</mosaic_0001>

<bundles_post_ra>
// kernel: tpu_custom_call.1
= control target key start
LH: loop header
LB: loop body
LE: loop exit
PB: predicated region body
PF: predicated region fallthrough
CT: control target
= control target key end

     0   :  { %7 = vsyncpa [#allocation3], 0  ;;  %s2250_s0 = inlined_call_operand.vmem [shape: f32[32,2], index: 0, kind: input, shape index: {}]   ;;  %s2251_s1 = inlined_call_operand.hbm [shape: bf16[6,128,128], index: 1, kind: input, shape index: {}]   ;;  %s2252_s2 = inlined_call_operand.hbm [shape: f32[32,128], index: 2, kind: output, shape index: {}]  }
   0x1   :  { %8 = vsyncpa [#allocation4], 0 }
   0x2   :  { %10 = vsyncpa [#allocation4 + $0x1], 0  ;;  %s2004_s9 = smov 0   ;;  %s2006_s10 = smov 0  }
   0x3   :  { %s2008_s11 = smov 0   ;;  %s2010_s12 = smov 0  }
   0x4 LB: > { %s2025_s13 = sadd.s32 4294967295, %s1977_s12   ;;  %s1360_s14 = sadd.s32 4294967294, %s1977_s12   ;;  %s1977_s12 = sphi %s2010_s12, %s2260_s12   ;;  %s1973_s11 = sphi %s2008_s11, %s2259_s11   ;;  %s1969_s10 = sphi %s2006_s10, %s2258_s10   ;;  %s1965_s9 = sphi %s2004_s9, %s2257_s9  }
   0x5   : > { %s2029_s15 = sadd.s32 1, %s1977_s12   ;;  %s70_s16 = sadd.s32 1, %s1973_s11 }
   0x6   : > { %s67_s17 = ssub.s32 %s1977_s12, %s2029_s15  ;;  %p80_p0 = scmp.ne.s32.totalorder %s1973_s11, %s1969_s10 }
   0x7   : > { %p68_p1 = scmp.eq.s32.totalorder %s67_s17, 0  ;;  %p81_p2 = scmp.eq.s32.totalorder %s2025_s13, 1 }
   0x8   : > { %p86_p3 = scmp.ne.s32.totalorder %s1969_s10, %s1965_s9  ;;  %p87_p4 = scmp.eq.s32.totalorder %s1360_s14, 1 }
   0x9   : > { %s2040_s18 = scalar_select %p68_p1, %s1973_s11, %s70_s16  }
   0xa   : > { %p2042_p5 = por %p81_p2, %p80_p0  ;;  %p2046_p6 = por %p87_p4, %p86_p3 }
   0xb   : > { %p1361_p7 = scmp.ge.s32.totalorder %s1977_s12, 1  ;;  %p94_p8 = scmp.lt.s32.totalorder %s1977_s12, 3 }
   0xc   : > { %s2254_s20 = scalar_select %p2046_p6, 1, 0 }
   0xd   : > { %p1759_p9 = scmp.eq.s32.totalorder %s2025_s13, 0  ;;  %p2053_p10 = pnand %p1361_p7, %p94_p8 }
   0xe   : > { %s1979_s22 = smov [#allocation2]  }
   0xf   : > { %s106_s23 = sshll.u32 %s1979_s22, 4  ;;  %p1751_p11 = pneg %p2053_p10  ;;  %s107_s23 = int_to_ptr.vmem [resolvable:$true] %s106_s23 }
  0x10   : > { %s1898_s24 = scalar_lea.vmem %s107_s23, 6144  ;;  %p1906_p3 = scmp.lt.s32.totalorder %s107_s23, %s107_s23 }
  0x11   : > { %p1752_p12 = pnand %p1759_p9, %p1751_p11  ;;  %p1899_p0 = scmp.ne.s32.totalorder %s107_s23, %s1898_s24 }
  0x12   : > { %p1907_p4 = scmp.lt.s32.totalorder %s1898_s24, %s1898_s24 }
  0x13   : > { %p1889_p13 = pneg %p1752_p12 }
  0x14   : > { %p1908_p6 = por %p1907_p4, %p1906_p3 }
  0x15   : > { %p1901_p1 = pnand %p1899_p0, %p1889_p13 }
  0x17   : > { %p1902_p2 = pneg %p1901_p1 }
  0x19   : > { %p1909_p7 = pnand %p1908_p6, %p1902_p2 }
  0x1b   : > { %1912 = shalt.err (!%p1909_p7)
}
  0x1c   : > { %s1980_s25 = smov 64   ;;  %s1981_s26 = smov 4  }
  0x1d   : > { %1754 = dma.hbm_to_vmem [thread:$0]  (!%p1752_p12), %s2251_s1, 6144, %s107_s23, [#allocation3], %s1980_s25, %s1980_s25, %s1981_s26  }
  0x1e   : > { %131 = sbr.rel (%p2053_p10) target bundleno = 1802 (0x70a), region = 28 }
  0x23   : > { %1956 = dma.done.wait (%p1759_p9), [#allocation3], 6144  }
  0x24   : > { %1958 = vsyncadd (%p1759_p9), [#allocation3], 4294961152  ;;  %s1367_s29 = sshll.u32 %s2025_s13, 1  ;;  %v1982_v0 = vmov 0   ;;  %v1983_v1 = vmov 0.0   ;;  %v1807_v3 = vld [vmem:[#allocation2 + $0x78] sm:$0xff]   ;;  %v171_v19 = vlaneseq }
  0x25   : > { %1803 = vset.pattern.permute.xlu0 %v1982_v0  ;;  %p154_p6 = scmp.lt.s32.totalorder %s1367_s29, 3  ;;  %1545 = vmatprep.subr.bf16.mxu0 %v1983_v1  ;;  %v1808_v4 = vld [vmem:[#allocation2 + $0x70] sm:$0xff]   ;;  %v1984_v5 = vmov 1   ;;  %v1809_v6 = vld [vmem:[#allocation2 + $0x68] sm:$0xff]   ;;  %vm1985_vm0 = vmmov 0   ;;  %v1810_v7 = vld [vmem:[#allocation2 + $0x60] sm:$0xff]  }
  0x26   : > { %1565 = vmatprep.subr.bf16.mxu1 %v1983_v1  ;;  %1805 = vset.pattern.permute.xlu1 %v1982_v0  ;;  %v1815_v8 = vld [vmem:[#allocation2 + $0xb8] sm:$0xff]   ;;  %v1816_v9 = vld [vmem:[#allocation2 + $0xb0] sm:$0xff]   ;;  %v1817_v11 = vld [vmem:[#allocation2 + $0xa8] sm:$0xff]   ;;  %v172_v20 = vshrl.u32 %v171_v19, 7  ;;  %s150_s6 = sand.u32 1, %s1969_s10   ;;  %s1454_s16 = sshll.u32 %s2025_s13, 8 }
  0x27   : > { %s2262_s29 = smov (!%p154_p6, %s1367_s29), 3  ;;  %1546 = vmatpush3.bf16.msra.mxu0 %v1807_v3  ;;  %1561 = vmatprep.mubr.msk.bf16.mxu0 %vm1985_vm0, %v1983_v1  ;;  %v1811_v10 = vld [vmem:[#allocation2 + $0x58] sm:$0xff]   ;;  %v1812_v12 = vld [vmem:[#allocation2 + $0x50] sm:$0xff]   ;;  %v1818_v13 = vld [vmem:[#allocation2 + $0xa0] sm:$0xff]   ;;  %s1366_s7 = sshll.u32 %s150_s6, 4 }
  0x28   : > { %s1368_s30 = sshll.u32 %s2262_s29, 3  ;;  %1547 = vmatprep.subr.bf16.mxu0 %v1983_v1  ;;  %1581 = vmatprep.mubr.msk.bf16.mxu1 %vm1985_vm0, %v1983_v1  ;;  %v1813_v14 = vld [vmem:[#allocation2 + $0x48] sm:$0xff]   ;;  %v1819_v15 = vld [vmem:[#allocation2 + $0x98] sm:$0xff]   ;;  %v1814_v16 = vld [vmem:[#allocation2 + $0x40] sm:$0xff]   ;;  %v173_v22 = vsub.s32 0, %v172_v20  ;;  %v182_v24 = vsub.s32 1, %v172_v20  ;;  %s2205_s22 = scalar_lea.hbm %s2252_s2, %s1454_s16 }
  0x29   : > { %s2076_s5 = scalar_lea.vmem %s2250_s0, %s1368_s30  ;;  %1566 = vmatpush3.bf16.msra.mxu1 %v1815_v8  ;;  %v1820_v17 = vld [vmem:[#allocation2 + $0x90] sm:$0xff]   ;;  %v1821_v18 = vld [vmem:[#allocation2 + $0x88] sm:$0xff]   ;;  %v161_v21 = vld [vmem:[#allocation2] ss:$60 sps:$4 sm:$0xff]   ;;  %v188_v27 = vsub.s32 7, %v172_v20  ;;  %s2186_s8 = scalar_lea.vmem [#allocation5], %s1366_s7 }
  0x2a   : > { %v165_v2 = vld [vmem:[%s2076_s5] sm:$0xff]  ;;  %1567 = vmatprep.subr.bf16.mxu1 %v1983_v1  ;;  %v163_v23 = vunpack.c.l.bf16 %v161_v21  ;;  %v164_v28 = vunpack.c.h.bf16 %v161_v21  ;;  %v1823_v39 = vld [vmem:[#allocation2 + $0xf8] sm:$0xff]   ;;  %v1824_v40 = vld [vmem:[#allocation2 + $0xf0] sm:$0xff]   ;;  %s1286_s14 = sshll.u32 %s2186_s8, 4  ;;  %s2210_s23 = scalar_lea.sflag [#allocation4], %s150_s6  ;;  %s2200_s14 = int_to_ptr.vmem [resolvable:$true] %s1286_s14 }
  0x2b   : > { %168 = vperm.xlu0 %1803, %v165_v2   ;;  %1548 = vmatpush3.bf16.msra.mxu0 %v1808_v4  ;;  %v1822_v38 = vld [vmem:[#allocation2 + $0x80] sm:$0xff]   ;;  %v1825_v41 = vld [vmem:[#allocation2 + $0xe8] sm:$0xff]   ;;  %v1827_v43 = vld [vmem:[#allocation2 + $0xd8] sm:$0xff]   ;;  %s1913_s24 = scalar_lea.vmem %s2200_s14, 256  ;;  %s1986_s13 = smov [#allocation5]  }
  0x2c   : > { %1549 = vmatprep.subr.bf16.mxu0 %v1983_v1  ;;  %v2099_v26 = vrot.slane %v163_v23, %v173_v22  ;;  %v2101_v29 = vrot.slane %v163_v23, %v182_v24  ;;  %v2105_v33 = vrot.slane %v164_v28, %v188_v27  ;;  %v1826_v42 = vld [vmem:[#allocation2 + $0xe0] sm:$0xff]   ;;  %v1828_v44 = vld [vmem:[#allocation2 + $0xd0] sm:$0xff]   ;;  %v1829_v45 = vld [vmem:[#allocation2 + $0xc8] sm:$0xff]   ;;  %p1914_p8 = scmp.ne.s32.totalorder %s2200_s14, %s1913_s24  ;;  %s1917_s25 = sshll.u32 %s1986_s13, 4  ;;  %s1918_s25 = int_to_ptr.vmem [resolvable:$false] %s1917_s25 }
  0x2d   : > { %1568 = vmatpush3.bf16.msra.mxu1 %v1816_v9  ;;  %v1830_v52 = vld [vmem:[#allocation2 + $0xc0] sm:$0xff]   ;;  %v727_v53 = vld [vmem:[%s2076_s5 + $0x8] sm:$0xff]  ;;  %v1831_v54 = vld [vmem:[#allocation2 + $0x138] sm:$0xff]   ;;  %s1919_s26 = scalar_lea.vmem %s1918_s25, 512  ;;  %p1920_p11 = scmp.lt.s32.totalorder %s2200_s14, %s1918_s25 }
  0x2e   : > { %1569 = vmatprep.subr.bf16.mxu1 %v1983_v1  ;;  %730 = vperm.xlu1 %1805, %v727_v53   ;;  %v1832_v55 = vld [vmem:[#allocation2 + $0x130] sm:$0xff]   ;;  %v1833_v56 = vld [vmem:[#allocation2 + $0x128] sm:$0xff]   ;;  %v1834_v57 = vld [vmem:[#allocation2 + $0x120] sm:$0xff]   ;;  %p1915_p9 = pnand %p1914_p8, %p2042_p5  ;;  %p1921_p12 = scmp.lt.s32.totalorder %s1919_s26, %s1913_s24 }
  0x2f   : > { %1804 = vset.pattern.permute.xlu0 %v1984_v5  ;;  %1550 = vmatpush3.bf16.msra.mxu0 %v1809_v6  ;;  %v1835_v58 = vld [vmem:[#allocation2 + $0x118] sm:$0xff]   ;;  %v1836_v59 = vld [vmem:[#allocation2 + $0x110] sm:$0xff]   ;;  %v1837_v60 = vld [vmem:[#allocation2 + $0x108] sm:$0xff]  }
  0x30   : > { %177 = vperm.xlu0 %1804, %v165_v2   ;;  %1551 = vmatprep.subr.bf16.mxu0 %v1983_v1  ;;  %v1838_v4 = vld [vmem:[#allocation2 + $0x100] sm:$0xff]   ;;  %v1848_v6 = vld [vmem:[#allocation2 + $0x170] sm:$0xff]   ;;  %v1851_v9 = vld [vmem:[#allocation2 + $0x158] sm:$0xff]   ;;  %p1916_p10 = pneg %p1915_p9  ;;  %p1922_p13 = por %p1921_p12, %p1920_p11 }
  0x31   : > { %1570 = vmatpush3.bf16.msra.mxu1 %v1817_v11  ;;  %v1850_v8 = vld [vmem:[#allocation2 + $0x160] sm:$0xff]   ;;  %v1853_v11 = vld [vmem:[#allocation2 + $0x148] sm:$0xff]   ;;  %v1840_v19 = vld [vmem:[#allocation2 + $0x70] sm:$0xff]  }
  0x32   : > { %1571 = vmatprep.subr.bf16.mxu1 %v1983_v1  ;;  %1806 = vset.pattern.permute.xlu1 %v1984_v5  ;;  %v1847_v5 = vld [vmem:[#allocation2 + $0x178] sm:$0xff]   ;;  %v1841_v20 = vld [vmem:[#allocation2 + $0x68] sm:$0xff]   ;;  %v1842_v22 = vld [vmem:[#allocation2 + $0x60] sm:$0xff]   ;;  %p1923_p0 = pnand %p1922_p13, %p1916_p10 }
  0x33   : > { %1552 = vmatpush3.bf16.msra.mxu0 %v1810_v7  ;;  %735 = vperm.xlu1 %1806, %v727_v53   ;;  %v1849_v7 = vld [vmem:[#allocation2 + $0x168] sm:$0xff]   ;;  %v1843_v24 = vld [vmem:[#allocation2 + $0x58] sm:$0xff]   ;;  %v1844_v28 = vld [vmem:[#allocation2 + $0x50] sm:$0xff]  }
  0x34   : > { %1553 = vmatprep.subr.bf16.mxu0 %v1983_v1 }
  0x35   : > { %1572 = vmatpush3.bf16.msra.mxu1 %v1818_v13 }
  0x36   : > { %1573 = vmatprep.subr.bf16.mxu1 %v1983_v1 }
  0x37   : > { %1554 = vmatpush3.bf16.msra.mxu0 %v1811_v10  ;;  %v1852_v10 = vld [vmem:[#allocation2 + $0x150] sm:$0xff]  }
  0x38   : > { %1555 = vmatprep.subr.bf16.mxu0 %v1983_v1 }
  0x39   : > { %1574 = vmatpush3.bf16.msra.mxu1 %v1819_v15  ;;  %v1839_v15 = vld [vmem:[#allocation2 + $0x78] sm:$0xff]  }
  0x3a   : > { %1575 = vmatprep.subr.bf16.mxu1 %v1983_v1 }
  0x3b   : > { %1556 = vmatpush3.bf16.msra.mxu0 %v1812_v12 }
  0x3c   : > { %1557 = vmatprep.subr.bf16.mxu0 %v1983_v1 }
  0x3d   : > { %1576 = vmatpush3.bf16.msra.mxu1 %v1820_v17 }
  0x3e   : > { %1577 = vmatprep.subr.bf16.mxu1 %v1983_v1 }
  0x3f   : > { %1558 = vmatpush3.bf16.msra.mxu0 %v1813_v14 }
  0x40   : > { %1559 = vmatprep.subr.bf16.mxu0 %v1983_v1 }
  0x41   : > { %1578 = vmatpush3.bf16.msra.mxu1 %v1821_v18 }
  0x42   : > { %1579 = vmatprep.subr.bf16.mxu1 %v1983_v1 }
  0x43   : > { %1560 = vmatpush3.bf16.msra.mxu0 %v1814_v16 }
  0x44   : > { %1585 = vmatprep.subr.bf16.mxu0 %v1983_v1 }
  0x45   : > { %1580 = vmatpush3.bf16.msra.mxu1 %v1822_v38  ;;  %v1855_v38 = vld [vmem:[#allocation2 + $0xb8] sm:$0xff]  }
  0x46   : > { %1605 = vmatprep.subr.bf16.mxu1 %v1983_v1 }
  0xa6   : > { %v169_v25 = vpop.permute.xlu0 %168 }
  0xa7   : > { %v175_v31 = vmul.f32 %v2099_v26, %v169_v25 }
  0xa9   : > { %v731_v21 = vpop.permute.xlu1 %730 }
  0xaa   : > { %v733_v25 = vmul.f32 %v731_v21, %v2099_v26  ;;  %v1882_v21 = vld [vmem:[#allocation2 + $0x160] sm:$0xff]  }
  0xab   : > { %v178_v30 = vpop.permute.xlu0 %177 }
  0xac   : > { %v184_v32 = vmul.f32 %v2101_v29, %v178_v30 }
  0xae   : > { %v185_v34 = vadd.f32 %v184_v32, %v175_v31  ;;  %v736_v23 = vpop.permute.xlu1 %735  ;;  %v1845_v31 = vld [vmem:[#allocation2 + $0x48] sm:$0xff]  }
  0xaf   : > { %v738_v27 = vmul.f32 %v736_v23, %v2101_v29  ;;  %v1854_v29 = vld [vmem:[#allocation2 + $0x140] sm:$0xff]   ;;  %v1884_v23 = vld [vmem:[#allocation2 + $0x150] sm:$0xff]  }
  0xb0   : > { %v190_v35 = vadd.f32 %v2105_v33, %v185_v34  ;;  %v1846_v34 = vld [vmem:[#allocation2 + $0x40] sm:$0xff]  }
  0xb1   : > { %v739_v30 = vadd.f32 %v738_v27, %v733_v25 }
  0xb2   : > { %v191_v36 = vmax.f32 %v190_v35, 0.0 }
  0xb3   : > { %v740_v32 = vadd.f32 %v739_v30, %v2105_v33 }
  0xb4   : > { %v192_v37 = vpack.c.bf16 %v191_v36, %v191_v36 }
  0xb5   : > { %v741_v35 = vmax.f32 %v740_v32, 0.0 }
  0xb6   : > { %1562 = vmatmul.mubr.bf16.vlgmr.msra.gmra.mxu0 %v192_v37 }
  0xb7   : > { %1601 = vmatprep.mubr.msk.bf16.mxu0 %vm1985_vm0, %v1983_v1  ;;  %1586 = vmatpush3.bf16.msra.mxu0 %v1823_v39  ;;  %v742_v26 = vpack.c.bf16 %v741_v35, %v741_v35 }
  0xb8   : > { %1587 = vmatprep.subr.bf16.mxu0 %v1983_v1 }
  0xbb   : > { %1588 = vmatpush3.bf16.msra.mxu0 %v1824_v40 }
  0xbc   : > { %1589 = vmatprep.subr.bf16.mxu0 %v1983_v1 }
  0xbf   : > { %1590 = vmatpush3.bf16.msra.mxu0 %v1825_v41 }
  0xc0   : > { %1591 = vmatprep.subr.bf16.mxu0 %v1983_v1 }
  0xc3   : > { %1592 = vmatpush3.bf16.msra.mxu0 %v1826_v42  ;;  %v1856_v42 = vld [vmem:[#allocation2 + $0xb0] sm:$0xff]  }
  0xc4   : > { %1593 = vmatprep.subr.bf16.mxu0 %v1983_v1 }
  0xc7   : > { %1594 = vmatpush3.bf16.msra.mxu0 %v1827_v43  ;;  %v1857_v43 = vld [vmem:[#allocation2 + $0xa8] sm:$0xff]  }
  0xc8   : > { %1595 = vmatprep.subr.bf16.mxu0 %v1983_v1 }
  0xcb   : > { %1596 = vmatpush3.bf16.msra.mxu0 %v1828_v44  ;;  %v1858_v44 = vld [vmem:[#allocation2 + $0xa0] sm:$0xff]  }
  0xcc   : > { %1597 = vmatprep.subr.bf16.mxu0 %v1983_v1 }
  0xcf   : > { %1598 = vmatpush3.bf16.msra.mxu0 %v1829_v45  ;;  %v1859_v45 = vld [vmem:[#allocation2 + $0x98] sm:$0xff]  }
  0xd0   : > { %1599 = vmatprep.subr.bf16.mxu0 %v1983_v1 }
  0xd3   : > { %1600 = vmatpush3.bf16.msra.mxu0 %v1830_v52 }
  0xd4   : > { %1625 = vmatprep.subr.bf16.mxu0 %v1983_v1 }
 0x176   : > { %v292_v46 = vpop.f32.mrf.mxu0 }
 0x177   : > { %v298_v47 = vmax.f32 %v292_v46, 0.0  ;;  %v1860_v46 = vld [vmem:[#allocation2 + $0x90] sm:$0xff]  }
 0x178   : > { %v1563_v48 = vpop.f32.mrf.mxu0 }
 0x179   : > { %v299_v49 = vpack.c.bf16 %v298_v47, %v298_v47  ;;  %v1861_v47 = vld [vmem:[#allocation2 + $0x88] sm:$0xff]   ;;  %v1862_v48 = vld [vmem:[#allocation2 + $0x80] sm:$0xff]  }
 0x17a   : > { %v295_v50 = vpop.f32.mrf.mxu0 }
 0x17b   : > { %1582 = vmatmul.mubr.bf16.vlgmr.msra.gmra.mxu1 %v299_v49 }
 0x17c   : > { %v1564_v51 = vpop.f32.mrf.mxu0  ;;  %1621 = vmatprep.mubr.msk.bf16.mxu1 %vm1985_vm0, %v1983_v1  ;;  %1606 = vmatpush3.bf16.msra.mxu1 %v1831_v54 }
 0x17d   : > { %1607 = vmatprep.subr.bf16.mxu1 %v1983_v1 }
 0x180   : > { %1608 = vmatpush3.bf16.msra.mxu1 %v1832_v55  ;;  %v1863_v55 = vld [vmem:[#allocation2 + $0xf8] sm:$0xff]  }
 0x181   : > { %1609 = vmatprep.subr.bf16.mxu1 %v1983_v1 }
 0x184   : > { %1610 = vmatpush3.bf16.msra.mxu1 %v1833_v56  ;;  %v1864_v56 = vld [vmem:[#allocation2 + $0xf0] sm:$0xff]  }
 0x185   : > { %1611 = vmatprep.subr.bf16.mxu1 %v1983_v1 }
 0x188   : > { %1612 = vmatpush3.bf16.msra.mxu1 %v1834_v57  ;;  %v1865_v57 = vld [vmem:[#allocation2 + $0xe8] sm:$0xff]  }
 0x189   : > { %1613 = vmatprep.subr.bf16.mxu1 %v1983_v1 }
 0x18c   : > { %1614 = vmatpush3.bf16.msra.mxu1 %v1835_v58  ;;  %v1866_v58 = vld [vmem:[#allocation2 + $0xe0] sm:$0xff]  }
 0x18d   : > { %1615 = vmatprep.subr.bf16.mxu1 %v1983_v1 }
 0x190   : > { %1616 = vmatpush3.bf16.msra.mxu1 %v1836_v59  ;;  %v1867_v59 = vld [vmem:[#allocation2 + $0xd8] sm:$0xff]  }
 0x191   : > { %1617 = vmatprep.subr.bf16.mxu1 %v1983_v1 }
 0x194   : > { %1618 = vmatpush3.bf16.msra.mxu1 %v1837_v60  ;;  %v1868_v60 = vld [vmem:[#allocation2 + $0xd0] sm:$0xff]  }
 0x195   : > { %1619 = vmatprep.subr.bf16.mxu1 %v1983_v1 }
 0x198   : > { %1620 = vmatpush3.bf16.msra.mxu1 %v1838_v4  ;;  %v1875_v4 = vld [vmem:[#allocation2 + $0x118] sm:$0xff]  }
 0x199   : > { %1645 = vmatprep.subr.bf16.mxu1 %v1983_v1 }
 0x23b   : > { %v399_v61 = vpop.f32.mrf.mxu1 }
 0x23c   : > { %v405_v62 = vmax.f32 %v399_v61, 0.0  ;;  %v1869_v61 = vld [vmem:[#allocation2 + $0xc8] sm:$0xff]  }
 0x23d   : > { %v1583_v63 = vpop.f32.mrf.mxu1 }
 0x23e   : > { %v406_v0 = vpack.c.bf16 %v405_v62, %v405_v62  ;;  %v1870_v62 = vld [vmem:[#allocation2 + $0xc0] sm:$0xff]   ;;  %v1871_v63 = vld [vmem:[#allocation2 + $0x138] sm:$0xff]  }
 0x23f   : > { %v402_v2 = vpop.f32.mrf.mxu1 }
 0x240   : > { %1602 = vmatmul.mubr.bf16.vlgmr.msra.gmra.mxu0 %v406_v0  ;;  %v1872_v0 = vld [vmem:[#allocation2 + $0x130] sm:$0xff]   ;;  %v1873_v2 = vld [vmem:[#allocation2 + $0x128] sm:$0xff]  }
 0x241   : > { %v1584_v3 = vpop.f32.mrf.mxu1  ;;  %1641 = vmatprep.mubr.msk.bf16.mxu0 %vm1985_vm0, %v1983_v1  ;;  %1626 = vmatpush3.bf16.msra.mxu0 %v1847_v5  ;;  %v1876_v5 = vld [vmem:[#allocation2 + $0x110] sm:$0xff]  }
 0x242   : > { %1627 = vmatprep.subr.bf16.mxu0 %v1983_v1  ;;  %v1874_v3 = vld [vmem:[#allocation2 + $0x120] sm:$0xff]  }
 0x245   : > { %1628 = vmatpush3.bf16.msra.mxu0 %v1848_v6  ;;  %v1877_v6 = vld [vmem:[#allocation2 + $0x108] sm:$0xff]  }
 0x246   : > { %1629 = vmatprep.subr.bf16.mxu0 %v1983_v1 }
 0x249   : > { %1630 = vmatpush3.bf16.msra.mxu0 %v1849_v7 }
 0x24a   : > { %1631 = vmatprep.subr.bf16.mxu0 %v1983_v1 }
 0x24d   : > { %1632 = vmatpush3.bf16.msra.mxu0 %v1850_v8 }
 0x24e   : > { %1633 = vmatprep.subr.bf16.mxu0 %v1983_v1 }
 0x251   : > { %1634 = vmatpush3.bf16.msra.mxu0 %v1851_v9 }
 0x252   : > { %1635 = vmatprep.subr.bf16.mxu0 %v1983_v1 }
 0x255   : > { %1636 = vmatpush3.bf16.msra.mxu0 %v1852_v10 }
 0x256   : > { %1637 = vmatprep.subr.bf16.mxu0 %v1983_v1 }
 0x259   : > { %1638 = vmatpush3.bf16.msra.mxu0 %v1853_v11 }
 0x25a   : > { %1639 = vmatprep.subr.bf16.mxu0 %v1983_v1 }
 0x25d   : > { %1640 = vmatpush3.bf16.msra.mxu0 %v1854_v29 }
 0x25e   : > { %1665 = vmatprep.subr.bf16.mxu0 %v1983_v1 }
 0x300   : > { %v506_v12 = vpop.f32.mrf.mxu0 }
 0x301   : > { %v512_v13 = vmax.f32 %v506_v12, 0.0 }
 0x302   : > { %v1603_v14 = vpop.f32.mrf.mxu0 }
 0x303   : > { %v513_v16 = vpack.c.bf16 %v512_v13, %v512_v13 }
 0x304   : > { %v509_v17 = vpop.f32.mrf.mxu0 }
 0x305   : > { %1622 = vmatmul.mubr.bf16.vlgmr.msra.gmra.mxu1 %v513_v16  ;;  %v1878_v17 = vld [vmem:[#allocation2 + $0x100] sm:$0xff]  }
 0x306   : > { %1646 = vmatpush3.bf16.msra.mxu1 %v1839_v15  ;;  %v1604_v18 = vpop.f32.mrf.mxu0  ;;  %1661 = vmatprep.mubr.msk.bf16.mxu1 %vm1985_vm0, %v1983_v1 }
 0x307   : > { %1647 = vmatprep.subr.bf16.mxu1 %v1983_v1  ;;  %v1879_v18 = vld [vmem:[#allocation2 + $0x178] sm:$0xff]  }
 0x30a   : > { %1648 = vmatpush3.bf16.msra.mxu1 %v1840_v19  ;;  %v1880_v19 = vld [vmem:[#allocation2 + $0x170] sm:$0xff]  }
 0x30b   : > { %1649 = vmatprep.subr.bf16.mxu1 %v1983_v1 }
 0x30e   : > { %1650 = vmatpush3.bf16.msra.mxu1 %v1841_v20  ;;  %v1881_v20 = vld [vmem:[#allocation2 + $0x168] sm:$0xff]  }
 0x30f   : > { %1651 = vmatprep.subr.bf16.mxu1 %v1983_v1 }
 0x312   : > { %1652 = vmatpush3.bf16.msra.mxu1 %v1842_v22  ;;  %v1883_v22 = vld [vmem:[#allocation2 + $0x158] sm:$0xff]  }
 0x313   : > { %1653 = vmatprep.subr.bf16.mxu1 %v1983_v1 }
 0x316   : > { %1654 = vmatpush3.bf16.msra.mxu1 %v1843_v24  ;;  %v1885_v24 = vld [vmem:[#allocation2 + $0x148] sm:$0xff]  }
 0x317   : > { %1655 = vmatprep.subr.bf16.mxu1 %v1983_v1 }
 0x31a   : > { %1656 = vmatpush3.bf16.msra.mxu1 %v1844_v28 }
 0x31b   : > { %1657 = vmatprep.subr.bf16.mxu1 %v1983_v1 }
 0x31e   : > { %1658 = vmatpush3.bf16.msra.mxu1 %v1845_v31 }
 0x31f   : > { %1659 = vmatprep.subr.bf16.mxu1 %v1983_v1 }
 0x322   : > { %1660 = vmatpush3.bf16.msra.mxu1 %v1846_v34  ;;  %v1886_v34 = vld [vmem:[#allocation2 + $0x140] sm:$0xff]  }
 0x323   : > { %1685 = vmatprep.subr.bf16.mxu1 %v1983_v1 }
 0x325   : > { %1662 = vmatmul.mubr.bf16.vlgmr.msra.gmra.mxu1 %v742_v26 }
 0x326   : > { %1701 = vmatprep.mubr.msk.bf16.mxu1 %vm1985_vm0, %v1983_v1  ;;  %1686 = vmatpush3.bf16.msra.mxu1 %v1863_v55 }
 0x327   : > { %1687 = vmatprep.subr.bf16.mxu1 %v1983_v1 }
 0x32a   : > { %1688 = vmatpush3.bf16.msra.mxu1 %v1864_v56 }
 0x32b   : > { %1689 = vmatprep.subr.bf16.mxu1 %v1983_v1 }
 0x32e   : > { %1690 = vmatpush3.bf16.msra.mxu1 %v1865_v57 }
 0x32f   : > { %1691 = vmatprep.subr.bf16.mxu1 %v1983_v1 }
 0x332   : > { %1692 = vmatpush3.bf16.msra.mxu1 %v1866_v58 }
 0x333   : > { %1693 = vmatprep.subr.bf16.mxu1 %v1983_v1 }
 0x336   : > { %1694 = vmatpush3.bf16.msra.mxu1 %v1867_v59 }
 0x337   : > { %1695 = vmatprep.subr.bf16.mxu1 %v1983_v1 }
 0x33a   : > { %1696 = vmatpush3.bf16.msra.mxu1 %v1868_v60 }
 0x33b   : > { %1697 = vmatprep.subr.bf16.mxu1 %v1983_v1 }
 0x33e   : > { %1698 = vmatpush3.bf16.msra.mxu1 %v1869_v61 }
 0x33f   : > { %1699 = vmatprep.subr.bf16.mxu1 %v1983_v1 }
 0x342   : > { %1700 = vmatpush3.bf16.msra.mxu1 %v1870_v62 }
 0x343   : > { %1725 = vmatprep.subr.bf16.mxu1 %v1983_v1 }
 0x3c5   : > { %v613_v33 = vpop.f32.mrf.mxu1 }
 0x3c6   : > { %v619_v36 = vmax.f32 %v613_v33, 0.0 }
 0x3c7   : > { %v1623_v37 = vpop.f32.mrf.mxu1 }
 0x3c8   : > { %v620_v39 = vpack.c.bf16 %v619_v36, %v619_v36 }
 0x3c9   : > { %v616_v40 = vpop.f32.mrf.mxu1 }
 0x3ca   : > { %1642 = vmatmul.mubr.bf16.vlgmr.msra.gmra.mxu0 %v620_v39 }
 0x3cb   : > { %1666 = vmatpush3.bf16.msra.mxu0 %v1855_v38  ;;  %v1624_v41 = vpop.f32.mrf.mxu1  ;;  %1681 = vmatprep.mubr.msk.bf16.mxu0 %vm1985_vm0, %v1983_v1 }
 0x3cc   : > { %1667 = vmatprep.subr.bf16.mxu0 %v1983_v1 }
 0x3cf   : > { %1668 = vmatpush3.bf16.msra.mxu0 %v1856_v42 }
 0x3d0   : > { %1669 = vmatprep.subr.bf16.mxu0 %v1983_v1 }
 0x3d3   : > { %1670 = vmatpush3.bf16.msra.mxu0 %v1857_v43 }
 0x3d4   : > { %1671 = vmatprep.subr.bf16.mxu0 %v1983_v1 }
 0x3d7   : > { %1672 = vmatpush3.bf16.msra.mxu0 %v1858_v44 }
 0x3d8   : > { %1673 = vmatprep.subr.bf16.mxu0 %v1983_v1 }
 0x3db   : > { %1674 = vmatpush3.bf16.msra.mxu0 %v1859_v45 }
 0x3dc   : > { %1675 = vmatprep.subr.bf16.mxu0 %v1983_v1 }
 0x3df   : > { %1676 = vmatpush3.bf16.msra.mxu0 %v1860_v46 }
 0x3e0   : > { %1677 = vmatprep.subr.bf16.mxu0 %v1983_v1 }
 0x3e3   : > { %1678 = vmatpush3.bf16.msra.mxu0 %v1861_v47 }
 0x3e4   : > { %1679 = vmatprep.subr.bf16.mxu0 %v1983_v1 }
 0x3e5   : > { %v841_v49 = vpop.f32.mrf.mxu1 }
 0x3e6   : > { %v847_v50 = vmax.f32 %v841_v49, 0.0 }
 0x3e7   : > { %v1663_v51 = vpop.f32.mrf.mxu1  ;;  %1680 = vmatpush3.bf16.msra.mxu0 %v1862_v48 }
 0x3e8   : > { %v848_v52 = vpack.c.bf16 %v847_v50, %v847_v50  ;;  %1705 = vmatprep.subr.bf16.mxu0 %v1983_v1 }
 0x3e9   : > { %v844_v53 = vpop.f32.mrf.mxu1 }
 0x3ea   : > { %1682 = vmatmul.mubr.bf16.vlgmr.msra.gmra.mxu0 %v848_v52 }
 0x3eb   : > { %v1664_v54 = vpop.f32.mrf.mxu1  ;;  %1721 = vmatprep.mubr.msk.bf16.mxu0 %vm1985_vm0, %v1983_v1  ;;  %1706 = vmatpush3.bf16.msra.mxu0 %v1871_v63 }
 0x3ec   : > { %1707 = vmatprep.subr.bf16.mxu0 %v1983_v1 }
 0x3ef   : > { %1708 = vmatpush3.bf16.msra.mxu0 %v1872_v0 }
 0x3f0   : > { %1709 = vmatprep.subr.bf16.mxu0 %v1983_v1 }
 0x3f3   : > { %1710 = vmatpush3.bf16.msra.mxu0 %v1873_v2 }
 0x3f4   : > { %1711 = vmatprep.subr.bf16.mxu0 %v1983_v1 }
 0x3f7   : > { %1712 = vmatpush3.bf16.msra.mxu0 %v1874_v3 }
 0x3f8   : > { %1713 = vmatprep.subr.bf16.mxu0 %v1983_v1 }
 0x3fb   : > { %1714 = vmatpush3.bf16.msra.mxu0 %v1875_v4 }
 0x3fc   : > { %1715 = vmatprep.subr.bf16.mxu0 %v1983_v1 }
 0x3ff   : > { %1716 = vmatpush3.bf16.msra.mxu0 %v1876_v5 }
 0x400   : > { %1717 = vmatprep.subr.bf16.mxu0 %v1983_v1 }
 0x403   : > { %1718 = vmatpush3.bf16.msra.mxu0 %v1877_v6 }
 0x404   : > { %1719 = vmatprep.subr.bf16.mxu0 %v1983_v1 }
 0x407   : > { %1720 = vmatpush3.bf16.msra.mxu0 %v1878_v17 }
 0x48a   : > { %v720_v7 = vpop.f32.mrf.mxu0 }
 0x48b   : > { %726 = vst [vmem:[%s2186_s8] sm:$0xff] %v720_v7 }
 0x48c   : > { %v1643_v8 = vpop.f32.mrf.mxu0 }
 0x48e   : > { %v723_v9 = vpop.f32.mrf.mxu0 }
 0x490   : > { %v1644_v10 = vpop.f32.mrf.mxu0 }
 0x4aa   : > { %v947_v11 = vpop.f32.mrf.mxu0 }
 0x4ab   : > { %v953_v12 = vmax.f32 %v947_v11, 0.0 }
 0x4ac   : > { %v1683_v13 = vpop.f32.mrf.mxu0 }
 0x4ad   : > { %v954_v14 = vpack.c.bf16 %v953_v12, %v953_v12 }
 0x4ae   : > { %v950_v15 = vpop.f32.mrf.mxu0 }
 0x4af   : > { %1702 = vmatmul.mubr.bf16.vlgmr.msra.gmra.mxu1 %v954_v14 }
 0x4b0   : > { %v1684_v16 = vpop.f32.mrf.mxu0  ;;  %1741 = vmatprep.mubr.msk.bf16.mxu1 %vm1985_vm0, %v1983_v1  ;;  %1726 = vmatpush3.bf16.msra.mxu1 %v1879_v18 }
 0x4b1   : > { %1727 = vmatprep.subr.bf16.mxu1 %v1983_v1 }
 0x4b4   : > { %1728 = vmatpush3.bf16.msra.mxu1 %v1880_v19 }
 0x4b5   : > { %1729 = vmatprep.subr.bf16.mxu1 %v1983_v1 }
 0x4b8   : > { %1730 = vmatpush3.bf16.msra.mxu1 %v1881_v20 }
 0x4b9   : > { %1731 = vmatprep.subr.bf16.mxu1 %v1983_v1 }
 0x4bc   : > { %1732 = vmatpush3.bf16.msra.mxu1 %v1882_v21 }
 0x4bd   : > { %1733 = vmatprep.subr.bf16.mxu1 %v1983_v1 }
 0x4c0   : > { %1734 = vmatpush3.bf16.msra.mxu1 %v1883_v22 }
 0x4c1   : > { %1735 = vmatprep.subr.bf16.mxu1 %v1983_v1 }
 0x4c4   : > { %1736 = vmatpush3.bf16.msra.mxu1 %v1884_v23 }
 0x4c5   : > { %1737 = vmatprep.subr.bf16.mxu1 %v1983_v1 }
 0x4c8   : > { %1738 = vmatpush3.bf16.msra.mxu1 %v1885_v24 }
 0x4c9   : > { %1739 = vmatprep.subr.bf16.mxu1 %v1983_v1 }
 0x4cc   : > { %1740 = vmatpush3.bf16.msra.mxu1 %v1886_v34 }
 0x56f   : > { %v1053_v25 = vpop.f32.mrf.mxu1 }
 0x570   : > { %v1059_v27 = vmax.f32 %v1053_v25, 0.0 }
 0x571   : > { %v1703_v28 = vpop.f32.mrf.mxu1 }
 0x572   : > { %v1060_v30 = vpack.c.bf16 %v1059_v27, %v1059_v27 }
 0x573   : > { %v1056_v31 = vpop.f32.mrf.mxu1 }
 0x574   : > { %1722 = vmatmul.mubr.bf16.vlgmr.msra.gmra.mxu0 %v1060_v30 }
 0x575   : > { %v1704_v32 = vpop.f32.mrf.mxu1 }
 0x634   : > { %v1159_v35 = vpop.f32.mrf.mxu0 }
 0x635   : > { %v1165_v26 = vmax.f32 %v1159_v35, 0.0 }
 0x636   : > { %v1723_v29 = vpop.f32.mrf.mxu0 }
 0x637   : > { %v1166_v33 = vpack.c.bf16 %v1165_v26, %v1165_v26 }
 0x638   : > { %v1162_v36 = vpop.f32.mrf.mxu0 }
 0x639   : > { %1742 = vmatmul.mubr.bf16.vlgmr.msra.gmra.mxu1 %v1166_v33 }
 0x63a   : > { %v1724_v1 = vpop.f32.mrf.mxu0 }
 0x6f9   : > { %v1265_v37 = vpop.f32.mrf.mxu1 }
 0x6fa   : > { %1271 = vst [vmem:[%s2186_s8 + $0x8] sm:$0xff] %v1265_v37 }
 0x6fb   : > { %v1743_v38 = vpop.f32.mrf.mxu1 }
 0x6fc   : > { %1926 = shalt.err (!%p1923_p0)
}
 0x6fd   : > { %s1927_s27 = scalar_lea.hbm %s2205_s22, 256  ;;  %s1931_s30 = scalar_lea.hbm %s2252_s2, 512 }
 0x6fe   : > { %p1928_p1 = scmp.ne.s32.totalorder %s2205_s22, %s1927_s27  ;;  %p1932_p4 = scmp.lt.s32.totalorder %s2205_s22, %s2252_s2 }
 0x6ff   : > { %p1933_p7 = scmp.lt.s32.totalorder %s1931_s30, %s1927_s27 }
 0x700   : > { %p1929_p2 = pnand %p1928_p1, %p2042_p5 }
 0x701   : > { %p1934_p6 = por %p1933_p7, %p1932_p4 }
 0x702   : > { %p1930_p3 = pneg %p1929_p2 }
 0x704   : > { %p1935_p8 = pnand %p1934_p6, %p1930_p3 }
 0x706   : > { %1938 = shalt.err (!%p1935_p8)
}
 0x707   : > { %s1987_s5 = smov 128   ;;  %s1988_s6 = smov 8   ;;  %v1268_v39 = vpop.f32.mrf.mxu1 }
 0x708   : > { %1749 = dma.vmem_to_hbm [thread:$0]  (%p2042_p5), %s2200_s14, 256, %s2205_s22, %s2210_s23, %s1987_s5, %s1987_s5, %s1988_s6  }
 0x709   : > { %v1744_v40 = vpop.f32.mrf.mxu1 }
 0x70a PF: > { %p1761_p9 = scmp.ge.s32.totalorder %s1977_s12, 2  ;;  %s1301_s7 = sand.u32 1, %s1965_s9  }
 0x70b   : > { %p2256_p10 = scmp.ne.s32.totalorder %s2254_s20, 0  ;;  %s1302_s8 = scalar_lea.sflag [#allocation4], %s1301_s7 }
 0x70d   : > { %p1756_p11 = pnand %p1761_p9, %p2256_p10 }
 0x70f   : > { %p1757_p12 = pneg %p1756_p11 }
 0x711   : > { %1960 = dma.done.wait (%p1757_p12), %s1302_s8, 256  }
 0x712   : > { %1962 = vsyncadd (%p1757_p12), %s1302_s8, 4294967040  ;;  %p13_p5 = scmp.ge.s32.totalorder %s2029_s15, 4   ;;  %s2257_s9 = smov %s1969_s10 }
 0x713   : > { %s2258_s10 = smov %s1973_s11  ;;  %s2259_s11 = smov %s2040_s18 }
 0x714   : > { %s2260_s12 = smov %s2029_s15  ;;  %15 = sbr.rel (!%p13_p5) target bundleno = 4 (0x4), region = 73 }
 0x719   :  { %1307 = vsyncpa [#allocation3], 1 }
 0x71a   :  { %1309 = vsyncpa [#allocation3 + $0x1], 1 }
 0x71b   :  { %1310 = vsyncpa [#allocation4], 1 }
 0x71c   :  { %1312 = vsyncpa [#allocation4 + $0x1], 1 }

</bundles_post_ra>
